<compile_context>
chip_gen: v6e
topology: v6e:2x2x1
jax: 0.10.0
libtpu: 0.0.40
codegen_flags: <defaults>
</compile_context>

<pallas_src>
import functools
import math

import jax
import jax.numpy as jnp
from jax import lax
from jax.experimental import pallas as pl
from jax.experimental.pallas import tpu as pltpu

_INV_SQRT2 = 1.0 / math.sqrt(2.0)


def _layernorm_gelu(x_f32, gamma, beta, eps):
    # x_f32: (C, tT). Normalize over the feature axis C (sublanes, axis 0),
    # matching torch.nn.LayerNorm(n_feats) applied to (..., n_feats) after the
    # module's transpose. gamma/beta: (C, 1) float32, broadcast over T lanes.
    mean = jnp.mean(x_f32, axis=0, keepdims=True)
    var = jnp.mean(jnp.square(x_f32 - mean), axis=0, keepdims=True)
    xn = (x_f32 - mean) * lax.rsqrt(var + eps)
    y = xn * gamma + beta
    # Exact (erf) GELU, matching F.gelu default.
    return 0.5 * y * (1.0 + lax.erf(y * _INV_SQRT2))


def _adn_kernel_eval(gamma_ref, beta_ref, x_ref, o_ref, *, eps, transpose_out):
    g = _layernorm_gelu(x_ref[0].astype(jnp.float32),
                        gamma_ref[...], beta_ref[...], eps)
    if transpose_out:                       # module output layout (B, T, C)
        o_ref[0] = g.T.astype(o_ref.dtype)
    else:                                   # keep_shape=True: (B, C, T)
        o_ref[0] = g.astype(o_ref.dtype)


def _adn_kernel_train(gamma_ref, beta_ref, x_ref, bits_ref, o_ref, *,
                      eps, drop_p, transpose_out):
    g = _layernorm_gelu(x_ref[0].astype(jnp.float32),
                        gamma_ref[...], beta_ref[...], eps)
    # Dropout: keep iff 23-bit uniform >= p (integer compare + select, no
    # int->float convert). scale = 1/(1-p); p >= 1 drops everything.
    threshold = jnp.uint32(min(int(drop_p * float(1 << 23)), 1 << 23))
    keep = (bits_ref[0] & jnp.uint32(0x7FFFFF)) >= threshold
    scale = 0.0 if drop_p >= 1.0 else 1.0 / (1.0 - drop_p)
    g = jnp.where(keep, g * jnp.float32(scale), jnp.float32(0.0))
    if transpose_out:
        o_ref[0] = g.T.astype(o_ref.dtype)
    else:
        o_ref[0] = g.astype(o_ref.dtype)


def act_drop_norm_cnn1d(x, gamma, beta, *, dropout=0.1, eps=1e-5,
                        training=False, rng_key=None, keep_shape=False,
                        t_tile=2048, vmem_limit_bytes=48 * 1024 * 1024):
    """x: (B, n_feats, T). Returns (B, T, n_feats), or (B, n_feats, T) if keep_shape."""
    B, C, T = x.shape

    # Lane-axis tile over T: full axis if small, else a multiple of 128 so a
    # partial trailing block is still legal; keeps each block a few MB max.
    tT = T if T <= t_tile else t_tile
    assert tT == T or tT % 128 == 0
    nT = pl.cdiv(T, tT)

    gamma2 = gamma.astype(jnp.float32).reshape(C, 1)
    beta2 = beta.astype(jnp.float32).reshape(C, 1)

    x_spec = pl.BlockSpec((1, C, tT), lambda b, t: (b, 0, t))
    bits_spec = pl.BlockSpec((1, C, tT), lambda b, t: (b, 0, t))
    gam_spec = pl.BlockSpec((C, 1), lambda b, t: (0, 0))
    bet_spec = pl.BlockSpec((C, 1), lambda b, t: (0, 0))

    if keep_shape:
        out_shape = jax.ShapeDtypeStruct((B, C, T), x.dtype)
        out_spec = pl.BlockSpec((1, C, tT), lambda b, t: (b, 0, t))
    else:
        out_shape = jax.ShapeDtypeStruct((B, T, C), x.dtype)
        out_spec = pl.BlockSpec((1, tT, C), lambda b, t: (b, t, 0))

    cparams = pltpu.CompilerParams(
        dimension_semantics=("parallel", "parallel"),
        vmem_limit_bytes=int(vmem_limit_bytes))

    use_dropout = training and float(dropout) > 0.0
    if use_dropout:
        if rng_key is None:
            rng_key = jax.random.PRNGKey(0)
        bits = jax.random.bits(rng_key, (B, C, T), dtype=jnp.uint32)
        kernel = functools.partial(_adn_kernel_train, eps=float(eps),
                                   drop_p=float(dropout),
                                   transpose_out=not keep_shape)
        in_specs = [gam_spec, bet_spec, x_spec, bits_spec]
        args = (gamma2, beta2, x, bits)
    else:
        kernel = functools.partial(_adn_kernel_eval, eps=float(eps),
                                   transpose_out=not keep_shape)
        in_specs = [gam_spec, bet_spec, x_spec]
        args = (gamma2, beta2, x)

    return pl.pallas_call(
        kernel,
        out_shape=out_shape,
        grid_spec=pltpu.PrefetchScalarGridSpec(
            num_scalar_prefetch=0,
            grid=(B, nT),
            in_specs=in_specs,
            out_specs=out_spec),
        compiler_params=cparams,
    )(*args)


def _reference_eval(x, gamma, beta, eps=1e-5):
    # Pure-JAX reference of the module in eval mode (dropout = identity).
    xt = jnp.transpose(x, (0, 2, 1))
    mean = jnp.mean(xt, axis=-1, keepdims=True)
    var = jnp.mean(jnp.square(xt - mean), axis=-1, keepdims=True)
    xn = (xt - mean) / jnp.sqrt(var + eps)
    y = xn * gamma + beta
    return jax.nn.gelu(y, approximate=False)


if __name__ == "__main__":
    key = jax.random.PRNGKey(0)
    kx, kg, kb, kd = jax.random.split(key, 4)

    B, C, T = 2, 32, 16                 # (batch, n_feats, seq_len)
    x = jax.random.normal(kx, (B, C, T), dtype=jnp.float32)
    gamma = 1.0 + 0.1 * jax.random.normal(kg, (C,), dtype=jnp.float32)
    beta = 0.1 * jax.random.normal(kb, (C,), dtype=jnp.float32)

    ref = _reference_eval(x, gamma, beta)           # (B, T, C)

    # Eval mode, default keep_shape=False -> (B, T, n_feats).
    out_eval = act_drop_norm_cnn1d(x, gamma, beta, dropout=0.1,
                                   training=False, keep_shape=False)
    jax.block_until_ready(out_eval)
    assert out_eval.shape == (B, T, C)
    assert jnp.allclose(out_eval, ref, atol=1e-5, rtol=1e-5)

    # Eval mode, keep_shape=True -> (B, n_feats, T), no transposes anywhere.
    out_keep = act_drop_norm_cnn1d(x, gamma, beta, dropout=0.1,
                                   training=False, keep_shape=True)
    jax.block_until_ready(out_keep)
    assert out_keep.shape == (B, C, T)
    assert jnp.allclose(out_keep, jnp.transpose(ref, (0, 2, 1)),
                        atol=1e-5, rtol=1e-5)

    # Train mode: exercises the dropout path (mask bits fed from the wrapper).
    out_train = act_drop_norm_cnn1d(x, gamma, beta, dropout=0.1,
                                    training=True, rng_key=kd, keep_shape=False)
    jax.block_until_ready(out_train)
    assert out_train.shape == (B, T, C)
    assert bool(jnp.all(jnp.isfinite(out_train)))
    # Every surviving element is the eval output scaled by 1/(1-p).
    kept = out_train != 0
    assert jnp.allclose(jnp.where(kept, out_train, 0.0),
                        jnp.where(kept, ref / 0.9, 0.0), atol=1e-5, rtol=1e-5)

    print("KERNEL_OK")
</pallas_src>

<mosaic_0001>
module attributes {stable_mosaic.version = 11 : i64} {
  func.func @_adn_kernel_eval(%arg0: i32, %arg1: i32, %arg2: memref<32x1xf32, #tpu.memory_space<vmem>>, %arg3: memref<32x1xf32, #tpu.memory_space<vmem>>, %arg4: memref<1x32x16xf32, #tpu.memory_space<vmem>>, %arg5: memref<1x16x32xf32, #tpu.memory_space<vmem>>) attributes {dimension_semantics = [#tpu.dimension_semantics<parallel>, #tpu.dimension_semantics<parallel>], iteration_bounds = array<i64: 2, 1>, scalar_prefetch = 0 : i64, scratch_operands = 0 : i64, tpu.core_type = #tpu.core_type<tc>, window_params = [{pipeline_mode = #tpu.pipeline_mode<synchronous>, transform_indices = @transform_0, window_bounds = array<i64: 32, 1>}, {pipeline_mode = #tpu.pipeline_mode<synchronous>, transform_indices = @transform_1, window_bounds = array<i64: 32, 1>}, {transform_indices = @transform_2, window_bounds = array<i64: 1, 32, 16>}, {transform_indices = @transform_3, window_bounds = array<i64: 1, 16, 32>}]} {
    %c0 = arith.constant 0 : index
    %c0_0 = arith.constant 0 : index
    %c0_1 = arith.constant 0 : index
    %0 = vector.load %arg4[%c0, %c0_0, %c0_1] : memref<1x32x16xf32, #tpu.memory_space<vmem>>, vector<1x32x16xf32>
    %1 = vector.shape_cast %0 : vector<1x32x16xf32> to vector<32x16xf32>
    %c0_2 = arith.constant 0 : index
    %c0_3 = arith.constant 0 : index
    %2 = vector.load %arg2[%c0_2, %c0_3] : memref<32x1xf32, #tpu.memory_space<vmem>>, vector<32x1xf32>
    %c0_4 = arith.constant 0 : index
    %c0_5 = arith.constant 0 : index
    %3 = vector.load %arg3[%c0_4, %c0_5] : memref<32x1xf32, #tpu.memory_space<vmem>>, vector<32x1xf32>
    %cst = arith.constant dense<0.000000e+00> : vector<16xf32>
    %4 = vector.multi_reduction <add>, %1, %cst [0] : vector<32x16xf32> to vector<16xf32>
    %5 = vector.shape_cast %4 : vector<16xf32> to vector<1x16xf32>
    %cst_6 = arith.constant 3.200000e+01 : f32
    %6 = vector.broadcast %cst_6 : f32 to vector<1x16xf32>
    %7 = arith.divf %5, %6 : vector<1x16xf32>
    %8 = vector.broadcast %7 : vector<1x16xf32> to vector<32x16xf32>
    %9 = arith.subf %1, %8 : vector<32x16xf32>
    %10 = arith.mulf %9, %9 : vector<32x16xf32>
    %cst_7 = arith.constant dense<0.000000e+00> : vector<16xf32>
    %11 = vector.multi_reduction <add>, %10, %cst_7 [0] : vector<32x16xf32> to vector<16xf32>
    %12 = vector.shape_cast %11 : vector<16xf32> to vector<1x16xf32>
    %cst_8 = arith.constant 3.200000e+01 : f32
    %13 = vector.broadcast %cst_8 : f32 to vector<1x16xf32>
    %14 = arith.divf %12, %13 : vector<1x16xf32>
    %15 = vector.broadcast %7 : vector<1x16xf32> to vector<32x16xf32>
    %16 = arith.subf %1, %15 : vector<32x16xf32>
    %cst_9 = arith.constant 9.99999974E-6 : f32
    %17 = vector.broadcast %cst_9 : f32 to vector<1x16xf32>
    %18 = arith.addf %14, %17 : vector<1x16xf32>
    %19 = math.rsqrt %18 : vector<1x16xf32>
    %20 = vector.broadcast %19 : vector<1x16xf32> to vector<32x16xf32>
    %21 = arith.mulf %16, %20 : vector<32x16xf32>
    %22 = vector.broadcast %2 : vector<32x1xf32> to vector<32x16xf32>
    %23 = arith.mulf %21, %22 : vector<32x16xf32>
    %24 = vector.broadcast %3 : vector<32x1xf32> to vector<32x16xf32>
    %25 = arith.addf %23, %24 : vector<32x16xf32>
    %cst_10 = arith.constant 5.000000e-01 : f32
    %26 = vector.broadcast %cst_10 : f32 to vector<32x16xf32>
    %27 = arith.mulf %26, %25 : vector<32x16xf32>
    %cst_11 = arith.constant 0.707106769 : f32
    %28 = vector.broadcast %cst_11 : f32 to vector<32x16xf32>
    %29 = arith.mulf %25, %28 : vector<32x16xf32>
    %30 = math.erf %29 : vector<32x16xf32>
    %cst_12 = arith.constant 1.000000e+00 : f32
    %31 = vector.broadcast %cst_12 : f32 to vector<32x16xf32>
    %32 = arith.addf %31, %30 : vector<32x16xf32>
    %33 = arith.mulf %27, %32 : vector<32x16xf32>
    %34 = tpu.transpose %33, [1, 0] : vector<32x16xf32> -> vector<16x32xf32>
    %c0_13 = arith.constant 0 : index
    %c0_14 = arith.constant 0 : index
    %c0_15 = arith.constant 0 : index
    %35 = vector.load %arg5[%c0_13, %c0_14, %c0_15] : memref<1x16x32xf32, #tpu.memory_space<vmem>>, vector<1x16x32xf32>
    %36 = vector.shape_cast %35 : vector<1x16x32xf32> to vector<16x32xf32>
    %37 = vector.shape_cast %34 : vector<16x32xf32> to vector<1x16x32xf32>
    tpu.vector_store %arg5[%c0_13, %c0_14, %c0_15], %37 {strides = array<i32>} : memref<1x16x32xf32, #tpu.memory_space<vmem>>, vector<1x16x32xf32>,
    return
  }
  func.func @transform_0(%arg0: i32, %arg1: i32) -> (i32, i32) {
    %c0_i32 = arith.constant 0 : i32
    %c0_i32_0 = arith.constant 0 : i32
    %c0_i32_1 = arith.constant 0 : i32
    return %c0_i32, %c0_i32_0 : i32, i32
  }
  func.func @transform_1(%arg0: i32, %arg1: i32) -> (i32, i32) {
    %c0_i32 = arith.constant 0 : i32
    %c0_i32_0 = arith.constant 0 : i32
    %c0_i32_1 = arith.constant 0 : i32
    return %c0_i32, %c0_i32_0 : i32, i32
  }
  func.func @transform_2(%arg0: i32, %arg1: i32) -> (i32, i32, i32) {
    %c0_i32 = arith.constant 0 : i32
    %c0_i32_0 = arith.constant 0 : i32
    return %arg0, %c0_i32, %arg1 : i32, i32, i32
  }
  func.func @transform_3(%arg0: i32, %arg1: i32) -> (i32, i32, i32) {
    %c0_i32 = arith.constant 0 : i32
    %c0_i32_0 = arith.constant 0 : i32
    return %arg0, %arg1, %c0_i32 : i32, i32, i32
  }
}

</mosaic_0001>

<bundles_post_ra>
// kernel: tpu_custom_call.1
= control target key start
LH: loop header
LB: loop body
LE: loop exit
PB: predicated region body
PF: predicated region fallthrough
CT: control target
= control target key end

     0   :  { %8 = vsyncpa [#allocation3], 0  ;;  %s783_s0 = inlined_call_operand.vmem [shape: f32[32,1], index: 0, kind: input, shape index: {}]   ;;  %s784_s1 = inlined_call_operand.vmem [shape: f32[32,1], index: 1, kind: input, shape index: {}]   ;;  %s785_s2 = inlined_call_operand.vmem [shape: f32[2,32,16], index: 2, kind: input, shape index: {}]   ;;  %s786_s3 = inlined_call_operand.hbm [shape: f32[2,16,32], index: 3, kind: output, shape index: {}]  }
   0x1   :  { %10 = vsyncpa [#allocation3 + $0x1], 0  ;;  %s637_s12 = smov 0   ;;  %s639_s13 = smov 0  }
   0x2   :  { %s641_s14 = smov 0   ;;  %s643_s15 = smov 0  }
   0x3   :  { %s645_s16 = smov 0   ;;  %s647_s17 = smov 0  }
   0x4 LB: > { %s449_s18 = sadd.s32 4294967295, %s611_s17   ;;  %s450_s19 = sadd.s32 4294967294, %s611_s17   ;;  %s611_s17 = sphi %s647_s17, %s16_s17   ;;  %s607_s16 = sphi %s645_s16, %s793_s16   ;;  %s603_s15 = sphi %s643_s15, %s792_s15   ;;  %s599_s14 = sphi %s641_s14, %s791_s14   ;;  %s595_s13 = sphi %s639_s13, %s790_s13   ;;  %s591_s12 = sphi %s637_s12, %s789_s12  }
   0x5   : > { %s28_s20 = sadd.s32 1, %s607_s16  ;;  %s107_s21 = sadd.s32 1, %s599_s14 }
   0x6   : > { %p30_p0 = scmp.ge.s32.totalorder %s28_s20, 2  ;;  %p117_p1 = scmp.ne.s32.totalorder %s599_s14, %s595_s13 }
   0x7   : > { %p118_p2 = scmp.eq.s32.totalorder %s449_s18, 1  ;;  %p123_p3 = scmp.ne.s32.totalorder %s595_s13, %s591_s12 }
   0x8   : > { %s795_s20 = smov (%p30_p0, %s28_s20), 0  ;;  %p124_p5 = scmp.eq.s32.totalorder %s450_s19, 1 }
   0x9   : > { %p677_p4 = por %p118_p2, %p117_p1  ;;  %s102_s23 = ssub.s32 %s607_s16, %s795_s20 }
   0xa   : > { %p453_p6 = scmp.ge.s32.totalorder %s611_s17, 1  ;;  %p105_p7 = scmp.eq.s32.totalorder %s102_s23, 0 }
   0xb   : > { %p684_p8 = por %p124_p5, %p123_p3  ;;  %p159_p9 = scmp.lt.s32.totalorder %s611_s17, 3 }
   0xc   : > { %s690_s25 = scalar_select %p105_p7, %s599_s14, %s107_s21  }
   0xd   : > { %p160_p10 = pnand %p453_p6, %p159_p9 }
   0xe   : > { %p186_p11 = scmp.lt.s32.totalorder (!%p160_p10), %s603_s15, 1  ;;  %s463_s7 = sshll.u32 (!%p160_p10), %s603_s15, 8 }
   0xf   : > { %163 = sbr.rel (%p160_p10) target bundleno = 316 (0x13c), region = 32  ;;  %s736_s10 = scalar_lea.hbm (!%p160_p10), %s786_s3, %s463_s7 }
  0x14   : > { %v203_v0 = vld [vmem:[%s784_s1] sm:$0xff]  ;;  %v613_v2 = vmov 0   ;;  %s187_s30 = scalar_select %p186_p11, %s603_s15, 1  ;;  %v201_v3 = vld [vmem:[%s783_s0 + $0x10] sm:$0xff]  ;;  %v200_v4 = vld [vmem:[%s783_s0 + $0x8] sm:$0xff]  ;;  %vm207_vm0 = vcmask 130048  }
  0x15   : > { %v199_v1 = vld [vmem:[%s783_s0] sm:$0xff]  ;;  %524 = vset.pattern.permute.xlu1 %v613_v2  ;;  %523 = vset.pattern.permute.xlu0 %v613_v2  ;;  %v202_v7 = vld [vmem:[%s783_s0 + $0x18] sm:$0xff]  ;;  %v204_v8 = vld [vmem:[%s784_s1 + $0x8] sm:$0xff]  ;;  %vm351_vm1 = vcmask 261120   ;;  %s614_s15 = smov [#allocation2]  }
  0x16   : > { %277 = vperm.xlu1 %524, %v203_v0   ;;  %253 = vperm.xlu0 %523, %v199_v1   ;;  %s462_s8 = sshll.u32 %s187_s30, 5  ;;  %v206_v12 = vld [vmem:[%s784_s1 + $0x18] sm:$0xff]  ;;  %v205_v13 = vld [vmem:[%s784_s1 + $0x10] sm:$0xff]  ;;  %s183_s30 = sand.u32 1, %s595_s13  }
  0x17   : > { %s193_s11 = scalar_lea.vmem %s785_s2, %s462_s8  ;;  %s454_s4 = sshll.u32 %s183_s30, 4 }
  0x18   : > { %v195_v5 = vld [vmem:[%s193_s11] sm:$0xff]  ;;  %v196_v6 = vld [vmem:[%s193_s11 + $0x8] sm:$0xff]  ;;  %v197_v11 = vld [vmem:[%s193_s11 + $0x10] sm:$0xff]  ;;  %s185_s5 = scalar_lea.vmem [#allocation2], %s454_s4  ;;  %s539_s19 = sshll.u32 %s614_s15, 4  ;;  %s540_s19 = int_to_ptr.vmem [resolvable:$false] %s539_s19 }
  0x19   : > { %v208_v9 = vsel %vm207_vm0, %v195_v5, 0.0  ;;  %v209_v10 = vsel %vm207_vm0, %v196_v6, 0.0  ;;  %v211_v15 = vsel %vm207_vm0, %v197_v11, 0.0  ;;  %v198_v16 = vld [vmem:[%s193_s11 + $0x18] sm:$0xff]  ;;  %s370_s6 = sshll.u32 %s185_s5, 4  ;;  %s738_s11 = scalar_lea.sflag [#allocation3], %s183_s30  ;;  %s731_s6 = int_to_ptr.vmem [resolvable:$true] %s370_s6 }
  0x1a   : > { %263 = vperm.xlu1 %524, %v201_v3   ;;  %258 = vperm.xlu0 %523, %v200_v4   ;;  %v210_v14 = vadd.f32 %v209_v10, %v208_v9  ;;  %v213_v18 = vsel %vm207_vm0, %v198_v16, 0.0  ;;  %s535_s18 = scalar_lea.vmem %s731_s6, 256  ;;  %s541_s21 = scalar_lea.vmem %s540_s19, 512 }
  0x1b   : > { %p536_p12 = scmp.ne.s32.totalorder %s731_s6, %s535_s18  ;;  %p542_p1 = scmp.lt.s32.totalorder %s731_s6, %s540_s19 }
  0x1c   : > { %v212_v17 = vadd.f32 %v211_v15, %v210_v14  ;;  %p543_p2 = scmp.lt.s32.totalorder %s541_s21, %s535_s18 }
  0x1d   : > { %p537_p13 = pnand %p536_p12, %p677_p4 }
  0x1e   : > { %268 = vperm.xlu1 %524, %v202_v7   ;;  %282 = vperm.xlu0 %523, %v204_v8   ;;  %v214_v19 = vadd.f32 %v213_v18, %v212_v17  ;;  %p544_p3 = por %p543_p2, %p542_p1 }
  0x1f   : > { %p538_p0 = pneg %p537_p13 }
  0x20   : > { %v215_v20 = vrot.slane %v214_v19, 4 }
  0x21   : > { %p545_p5 = pnand %p544_p3, %p538_p0 }
  0x22   : > { %292 = vperm.xlu1 %524, %v206_v12   ;;  %287 = vperm.xlu0 %523, %v205_v13   ;;  %v216_v21 = vadd.f32 %v215_v20, %v214_v19 }
  0x24   : > { %v217_v22 = vrot.slane %v216_v21, 2 }
  0x26   : > { %v218_v23 = vadd.f32 %v217_v22, %v216_v21 }
  0x28   : > { %v219_v24 = vrot.slane %v218_v23, 1 }
  0x2a   : > { %v220_v25 = vadd.f32 %v219_v24, %v218_v23 }
  0x2c   : > { %v222_v26 = vmul.f32 0.03125, %v220_v25 }
  0x2e   : > { %v223_v27 = vsub.f32 %v195_v5, %v222_v26  ;;  %v224_v28 = vsub.f32 %v196_v6, %v222_v26  ;;  %v225_v29 = vsub.f32 %v197_v11, %v222_v26  ;;  %v226_v32 = vsub.f32 %v198_v16, %v222_v26 }
  0x30   : > { %v227_v30 = vmul.f32 %v223_v27, %v223_v27  ;;  %v228_v31 = vmul.f32 %v224_v28, %v224_v28  ;;  %v229_v33 = vmul.f32 %v225_v29, %v225_v29  ;;  %v230_v37 = vmul.f32 %v226_v32, %v226_v32 }
  0x32   : > { %v231_v34 = vsel %vm207_vm0, %v227_v30, 0.0  ;;  %v232_v35 = vsel %vm207_vm0, %v228_v31, 0.0  ;;  %v234_v38 = vsel %vm207_vm0, %v229_v33, 0.0  ;;  %v236_v40 = vsel %vm207_vm0, %v230_v37, 0.0 }
  0x33   : > { %v233_v36 = vadd.f32 %v232_v35, %v231_v34 }
  0x35   : > { %v235_v39 = vadd.f32 %v234_v38, %v233_v36 }
  0x37   : > { %v237_v41 = vadd.f32 %v236_v40, %v235_v39 }
  0x39   : > { %v238_v42 = vrot.slane %v237_v41, 4 }
  0x3b   : > { %v239_v43 = vadd.f32 %v238_v42, %v237_v41 }
  0x3d   : > { %v240_v44 = vrot.slane %v239_v43, 2 }
  0x3f   : > { %v241_v45 = vadd.f32 %v240_v44, %v239_v43 }
  0x41   : > { %v242_v46 = vrot.slane %v241_v45, 1 }
  0x43   : > { %v243_v47 = vadd.f32 %v242_v46, %v241_v45 }
  0x45   : > { %v244_v48 = vmul.f32 0.03125, %v243_v47 }
  0x47   : > { %v245_v49 = vadd.f32 1e-05, %v244_v48 }
  0x49   : > { %525 = vrsqrt.f32 %v245_v49 }
  0x56   : > { %v526_v50 = vpop.eup %525 }
  0x57   : > { %v247_v51 = vmul.f32 %v526_v50, %v223_v27  ;;  %v248_v56 = vmul.f32 %v526_v50, %v224_v28  ;;  %v249_v60 = vmul.f32 %v526_v50, %v225_v29  ;;  %v250_v62 = vmul.f32 %v526_v50, %v226_v32 }
  0x91   : > { %v278_v52 = vpop.permute.xlu1 %277  ;;  %v254_v53 = vpop.permute.xlu0 %253 }
  0x92   : > { %v271_v54 = vmul.f32 %v254_v53, %v247_v51 }
  0x94   : > { %v295_v55 = vadd.f32 %v278_v52, %v271_v54 }
  0x95   : > { %v264_v57 = vpop.permute.xlu1 %263  ;;  %v259_v58 = vpop.permute.xlu0 %258 }
  0x96   : > { %v303_v59 = vmul.f32 0.70710677, %v295_v55  ;;  %v272_v61 = vmul.f32 %v259_v58, %v248_v56  ;;  %v273_v2 = vmul.f32 %v264_v57, %v249_v60  ;;  %v299_v12 = vmul.f32 0.5, %v295_v55 }
  0x98   : > { %527 = verf.f32 %v303_v59 }
  0x99   : > { %v269_v63 = vpop.permute.xlu1 %268  ;;  %v283_v0 = vpop.permute.xlu0 %282 }
  0x9a   : > { %v296_v1 = vadd.f32 %v283_v0, %v272_v61  ;;  %v274_v3 = vmul.f32 %v269_v63, %v250_v62 }
  0x9c   : > { %v304_v4 = vmul.f32 0.70710677, %v296_v1  ;;  %v300_v16 = vmul.f32 0.5, %v296_v1 }
  0x9d   : > { %v293_v5 = vpop.permute.xlu1 %292  ;;  %v288_v6 = vpop.permute.xlu0 %287 }
  0x9e   : > { %529 = verf.f32 %v304_v4  ;;  %v298_v7 = vadd.f32 %v293_v5, %v274_v3  ;;  %v297_v8 = vadd.f32 %v288_v6, %v273_v2 }
  0xa0   : > { %v306_v9 = vmul.f32 0.70710677, %v298_v7  ;;  %v305_v10 = vmul.f32 0.70710677, %v297_v8  ;;  %v301_v21 = vmul.f32 0.5, %v297_v8  ;;  %v302_v25 = vmul.f32 0.5, %v298_v7 }
  0xa2   : > { %531 = verf.f32 %v306_v9 }
  0xa3   : > { %533 = verf.f32 %v305_v10 }
  0xa5   : > { %v528_v11 = vpop.eup %527 }
  0xa6   : > { %v311_v13 = vadd.f32 1.0, %v528_v11 }
  0xa8   : > { %v315_v14 = vmul.f32 %v311_v13, %v299_v12 }
  0xaa   : > { %319 = vxpose.xlu0.b32.start [1/4] (short) (narrow) %v315_v14, 16 }
  0xab   : > { %v530_v15 = vpop.eup %529 }
  0xac   : > { %v312_v17 = vadd.f32 1.0, %v530_v15 }
  0xae   : > { %v316_v18 = vmul.f32 %v312_v17, %v300_v16 }
  0xaf   : > { %v532_v19 = vpop.eup %531 }
  0xb0   : > { %v534_v20 = vpop.eup %533  ;;  %320 = vxpose.xlu0.b32.cont [2/4] (short) (narrow) %v316_v18, 16  ;;  %v314_v23 = vadd.f32 1.0, %v532_v19 }
  0xb1   : > { %v313_v22 = vadd.f32 1.0, %v534_v20 }
  0xb2   : > { %v318_v26 = vmul.f32 %v314_v23, %v302_v25 }
  0xb3   : > { %v317_v24 = vmul.f32 %v313_v22, %v301_v21 }
  0xb5   : > { %321 = vxpose.xlu0.b32.cont [3/4] (short) (narrow) %v317_v24, 16 }
  0xb9   : > { %322 = vxpose.xlu0.b32.end [4/4] (short) (narrow) %v318_v26, 16 }
 0x129   : > { %v335_v27 = vpop.trf.xlu0 }
 0x12a   : > { %352 = vst.msk [vmem:[%s185_s5] sm:$0xff] %vm351_vm1, %v335_v27 }
 0x12d   : > { %v336_v28 = vpop.trf.xlu0 }
 0x12e   : > { %353 = vst.msk [vmem:[%s185_s5 + $0x8] sm:$0xff] %vm351_vm1, %v336_v28 }
 0x12f   : > { %548 = shalt.err (!%p545_p5)
}
 0x130   : > { %s549_s23 = scalar_lea.hbm %s736_s10, 256  ;;  %s553_s28 = scalar_lea.hbm %s786_s3, 512 }
 0x131   : > { %p550_p6 = scmp.ne.s32.totalorder %s736_s10, %s549_s23  ;;  %p554_p10 = scmp.lt.s32.totalorder %s736_s10, %s786_s3 }
 0x132   : > { %p555_p11 = scmp.lt.s32.totalorder %s553_s28, %s549_s23 }
 0x133   : > { %p551_p7 = pnand %p550_p6, %p677_p4 }
 0x134   : > { %p556_p12 = por %p555_p11, %p554_p10 }
 0x135   : > { %p552_p9 = pneg %p551_p7 }
 0x137   : > { %p557_p13 = pnand %p556_p12, %p552_p9 }
 0x139   : > { %560 = shalt.err (!%p557_p13)
}
 0x13a   : > { %s615_s4 = smov 128   ;;  %s616_s5 = smov 8  }
 0x13b   : > { %464 = dma.vmem_to_hbm [thread:$0]  (%p677_p4), %s731_s6, 256, %s736_s10, %s738_s11, %s615_s4, %s615_s4, %s616_s5  }
 0x13c PF: > { %p470_p0 = scmp.ge.s32.totalorder %s611_s17, 2  ;;  %s385_s7 = sand.u32 1, %s591_s12  }
 0x13d   : > { %s386_s8 = scalar_lea.sflag [#allocation3], %s385_s7 }
 0x13e   : > { %p467_p1 = pnand %p470_p0, %p684_p8 }
 0x140   : > { %p468_p2 = pneg %p467_p1 }
 0x142   : > { %586 = dma.done.wait (%p468_p2), %s386_s8, 256  }
 0x143   : > { %588 = vsyncadd (%p468_p2), %s386_s8, 4294967040  ;;  %s16_s17 = sadd.s32 1, %s611_s17   ;;  %s789_s12 = smov %s595_s13 }
 0x144   : > { %p13_p3 = scmp.ge.s32.totalorder %s16_s17, 4   ;;  %s790_s13 = smov %s599_s14 }
 0x145   : > { %s791_s14 = smov %s690_s25  ;;  %s792_s15 = smov %s607_s16 }
 0x146   : > { %s793_s16 = smov %s795_s20  ;;  %15 = sbr.rel (!%p13_p3) target bundleno = 4 (0x4), region = 67 }
 0x14b   :  { %391 = vsyncpa [#allocation3], 1 }
 0x14c   :  { %393 = vsyncpa [#allocation3 + $0x1], 1 }

</bundles_post_ra>
